<compile_context>
chip_gen: v7x
topology: tpu7x:2x2x1
jax: 0.10.0
libtpu: 0.0.40
codegen_flags: <defaults>
</compile_context>

<pallas_src>
import math

import jax
import jax.numpy as jnp
from jax.experimental import pallas as pl
from jax.experimental.pallas import tpu as pltpu


# ---------- per-generation VMEM / block-size plan ----------

def _vmem_plan():
    """Return (vmem_limit_bytes, x_block_budget_bytes) per TPU generation."""
    cap = 64 << 20                              # conservative default (v7x per-TC VMEM)
    try:
        cap = int(getattr(pltpu.get_tpu_info(), "vmem_capacity_bytes", cap))
    except Exception:
        pass
    if cap > (96 << 20):                        # v5e / v6e: 128 MiB physical VMEM
        return 80 << 20, 14 << 20
    return 48 << 20, 8 << 20                    # v7x-class: 64 MiB per TensorCore


# ---------- kernel ----------

def _affine_kernel(x_ref, g_ref, b_ref, o_ref):
    # gamma/beta broadcast against the 2D x tile; compute in the promoted
    # (>= f32) precision and cast once on the store.
    # (Optional: cast gamma/beta to bf16 on v6e/v7x to halve VALU/vreg work;
    #  kept f32 here so results match the reference exactly.)
    o_ref[...] = (x_ref[...] * g_ref[...] + b_ref[...]).astype(o_ref.dtype)


# ---------- tiling helpers (trace-time Python only) ----------

def _sublane_align(itemsize):
    # dtype-dependent sublane packing: f32 -> 8, bf16 -> 16, int8/fp8 -> 32
    return {1: 32, 2: 16, 4: 8}.get(itemsize, 8)


def _fold_plan(m, c, max_lanes=2048):
    """Return (k, pad_rows): pad the (M, C) row count by pad_rows, then fold
    k rows into the lane axis -> lane width k*c (free reshape).

    Goal: lane-dense (multiple-of-128) output width whenever C % 128 != 0.
    """
    if m <= 1 or c >= max_lanes or c % 128 == 0:
        return 1, 0
    kmax = max(1, min(m, max_lanes // c))
    # 1) exact fold with lane-dense (multiple-of-128) width
    for k in range(kmax, 1, -1):
        if m % k == 0 and (k * c) % 128 == 0:
            return k, 0
    # 2) exact fold to a reasonably wide width (>= 512 lanes; only the last
    #    vreg per row stays partially masked)
    k_any = 1
    for k in range(kmax, 1, -1):
        if m % k == 0:
            k_any = k
            break
    if k_any * c >= 512:
        return k_any, 0
    # 3) small row padding (<= ~6% extra traffic) to enable a lane-dense fold;
    #    far cheaper than heavily masked few-lane stores for C << 128.
    k_need = 128 // math.gcd(c, 128)
    if k_need <= kmax:
        k = k_need
        while 2 * k <= kmax and 2 * k * c <= max_lanes and k * c < 512:
            k *= 2
        pad = (-m) % k
        if pad == 0 or pad * 16 <= m:
            return k, pad
        pad = (-m) % k_need
        if pad == 0 or pad * 16 <= m:
            return k_need, pad
    return k_any, 0


def _row_tile(rows, lanes, itemsize, budget):
    """Sublane-aligned row tile of roughly `budget` bytes (or full rows)."""
    sub = _sublane_align(itemsize)
    t = budget // max(1, lanes * itemsize)
    t = max(sub, (t // sub) * sub)
    return rows if rows <= t else t


def _cap_for_parallelism(other_blocks, extent, tile, unit, min_blocks=4):
    """Shrink `tile` (kept a multiple of `unit`) so the total number of
    parallel grid blocks reaches `min_blocks` when the data allows it."""
    cur = other_blocks * pl.cdiv(extent, tile)
    if cur >= min_blocks or tile <= unit:
        return tile
    need = -(-min_blocks // max(1, other_blocks))
    if extent < need * unit:
        return tile
    return min(tile, max(unit, (extent // need // unit) * unit))


def _spatial_to_sublane(C, HW, pack):
    """Fold factor s: reshape (N, C, HW) -> (N, C*s, HW//s) so the sublane
    pack is filled when C < pack.  Requires HW % s == 0 and keeps >=128 lanes."""
    if C >= pack or HW < 256:
        return 1
    target = -(-pack // C)
    best = 1
    for s in range(target, min(HW, 4 * target) + 1):
        if HW % s:
            continue
        lanes = HW // s
        if lanes < 128:
            break
        if lanes % 128 == 0:
            return s
        if best == 1:
            best = s
    return best


def _chan_fold(C, HW, max_lanes=4096):
    """Largest divisor g of C with g*HW <= max_lanes, preferring multiples of
    128 for the resulting lane width (used when HW < 128)."""
    best, best128 = 1, 0
    for g in range(1, C + 1):
        if C % g or g * HW > max_lanes:
            continue
        best = g
        if (g * HW) % 128 == 0:
            best128 = g
    return best128 if best128 else best


def _tile_4d(R, L, itemsize, budget, gamma_per_lane):
    """(row_tile, lane_tile) for the (N, R, L) view, sized against `budget`."""
    pack = _sublane_align(itemsize)
    # VMEM bytes per tile element: x in + out, double-buffered (~4x itemsize),
    # plus f32 gamma/beta blocks when they span the lane axis too.
    per_elem = 4 * itemsize + (16 if gamma_per_lane else 0)
    vmem_cap = 4 * budget
    tc = R if R <= 512 else 512
    cap = max(128, (vmem_cap // max(1, tc * per_elem)) // 128 * 128)
    tl = L if L <= cap else cap
    while tc > pack and tc * tl * per_elem > vmem_cap:
        tc = max(pack, (tc // 2) // pack * pack)
    return tc, tl


# ---------- wrapper ----------

def scale_offset(x, gamma, beta):
    """Pallas implementation of ScaleOffset.forward.

    x: (B, S, C)    -> x * gamma + beta                 (broadcast on last dim)
    x: (N, C, H, W) -> x * gamma.view(1,-1,1,1) + beta.view(1,-1,1,1)
    """
    gamma = gamma.astype(jnp.float32)
    beta = beta.astype(jnp.float32)
    itemsize = jnp.dtype(x.dtype).itemsize
    vmem_limit, budget = _vmem_plan()

    def _params(n_axes):
        return pltpu.CompilerParams(
            dimension_semantics=("parallel",) * n_axes,
            vmem_limit_bytes=vmem_limit,
        )

    if x.ndim == 3:
        B, S, C = x.shape
        M = B * S
        k, pad = _fold_plan(M, C)
        xf = x.reshape(M, C)
        if pad:
            xf = jnp.pad(xf, ((0, pad), (0, 0)))       # tiny pad -> lane-dense fold
        rows, lanes = (M + pad) // k, k * C
        x2 = xf.reshape(rows, lanes)                    # free reshape
        g2 = jnp.tile(gamma, (k,)).reshape(1, lanes)
        b2 = jnp.tile(beta, (k,)).reshape(1, lanes)

        tm = _row_tile(rows, lanes, itemsize, budget)
        tm = _cap_for_parallelism(1, rows, tm, _sublane_align(itemsize))

        out = pl.pallas_call(
            _affine_kernel,
            out_shape=jax.ShapeDtypeStruct((rows, lanes), x.dtype),
            grid=(pl.cdiv(rows, tm),),
            in_specs=[
                pl.BlockSpec((tm, lanes), lambda i: (i, 0)),
                pl.BlockSpec((1, lanes), lambda i: (0, 0)),
                pl.BlockSpec((1, lanes), lambda i: (0, 0)),
            ],
            out_specs=pl.BlockSpec((tm, lanes), lambda i: (i, 0)),
            compiler_params=_params(1),
        )(x2, g2, b2)
        out = out.reshape(M + pad, C)
        if pad:
            out = out[:M]
        return out.reshape(B, S, C)

    elif x.ndim == 4:
        N, C, H, W = x.shape
        HW = H * W
        pack = _sublane_align(itemsize)

        if HW < 128:
            # Lane-sparse spatial extent: fold channel groups into the lane
            # axis (free reshape) so stores are lane-dense instead of masked
            # few-lane vst.msk.  gamma/beta expand to (R, L) row blocks.
            g = _chan_fold(C, HW)
            R, L = C // g, g * HW
            x3 = x.reshape(N, R, L)
            g2 = jnp.repeat(gamma, HW).reshape(R, L)
            b2 = jnp.repeat(beta, HW).reshape(R, L)
            gamma_per_lane = True
        else:
            # Fold spatial positions into the sublane axis when C is smaller
            # than the sublane pack (f32: 8, bf16: 16, int8/fp8: 32).
            s = _spatial_to_sublane(C, HW, pack)
            R, L = C * s, HW // s
            x3 = x.reshape(N, R, L)
            g2 = jnp.repeat(gamma, s).reshape(R, 1)
            b2 = jnp.repeat(beta, s).reshape(R, 1)
            gamma_per_lane = False

        tc, tl = _tile_4d(R, L, itemsize, budget, gamma_per_lane)
        r_tiles = pl.cdiv(R, tc)
        tl = _cap_for_parallelism(N * r_tiles, L, tl, 128)
        l_tiles = pl.cdiv(L, tl)

        if gamma_per_lane:
            g_spec = pl.BlockSpec((tc, tl), lambda c, l, n: (c, l))
            b_spec = pl.BlockSpec((tc, tl), lambda c, l, n: (c, l))
        else:
            g_spec = pl.BlockSpec((tc, 1), lambda c, l, n: (c, 0))
            b_spec = pl.BlockSpec((tc, 1), lambda c, l, n: (c, 0))

        out = pl.pallas_call(
            _affine_kernel,
            out_shape=jax.ShapeDtypeStruct((N, R, L), x.dtype),
            # Batch axis innermost: gamma/beta block indices don't depend on
            # n, so their blocks stay VMEM-resident across consecutive steps.
            grid=(r_tiles, l_tiles, N),
            in_specs=[
                # Leading batch dim squeezed out of the kernel block (2D tile).
                pl.BlockSpec((None, tc, tl), lambda c, l, n: (n, c, l)),
                g_spec,
                b_spec,
            ],
            out_specs=pl.BlockSpec((None, tc, tl), lambda c, l, n: (n, c, l)),
            compiler_params=_params(3),
        )(x3, g2, b2)
        return out.reshape(N, C, H, W)

    else:
        raise ValueError(f"ScaleOffset expects 3D or 4D input, got {x.ndim}D")


# ---------- demo / check ----------

if __name__ == "__main__":
    key = jax.random.PRNGKey(0)
    k1, k2, k3, k4 = jax.random.split(key, 4)

    # Module __init__: gamma = ones(indim), beta = zeros(indim).
    # Use non-trivial deterministic values so broadcasting is actually exercised.
    indim = 4
    gamma = 1.0 + 0.1 * jax.random.normal(k1, (indim,), dtype=jnp.float32)
    beta = 0.1 * jax.random.normal(k2, (indim,), dtype=jnp.float32)

    # 4D NCHW case: (N, C, H, W) = (2, 4, 16, 16)
    x4 = jax.random.normal(k3, (2, indim, 16, 16), dtype=jnp.float32)
    y4 = jax.block_until_ready(scale_offset(x4, gamma, beta))
    ref4 = x4 * gamma.reshape(1, -1, 1, 1) + beta.reshape(1, -1, 1, 1)
    assert jnp.allclose(y4, ref4, atol=1e-6, rtol=1e-6), "4D mismatch"

    # 3D (B, S, C) case: (2, 8, 4)
    x3 = jax.random.normal(k4, (2, 8, indim), dtype=jnp.float32)
    y3 = jax.block_until_ready(scale_offset(x3, gamma, beta))
    ref3 = x3 * gamma + beta
    assert jnp.allclose(y3, ref3, atol=1e-6, rtol=1e-6), "3D mismatch"

    print("KERNEL_OK")
</pallas_src>

<mosaic_0001>
module attributes {stable_mosaic.version = 11 : i64} {
  func.func @_affine_kernel(%arg0: i32, %arg1: i32, %arg2: i32, %arg3: memref<1x8x128xf32, #tpu.memory_space<vmem>>, %arg4: memref<8x1xf32, #tpu.memory_space<vmem>>, %arg5: memref<8x1xf32, #tpu.memory_space<vmem>>, %arg6: memref<1x8x128xf32, #tpu.memory_space<vmem>>) attributes {dimension_semantics = [#tpu.dimension_semantics<parallel>, #tpu.dimension_semantics<parallel>, #tpu.dimension_semantics<parallel>], iteration_bounds = array<i64: 1, 1, 2>, scalar_prefetch = 0 : i64, scratch_operands = 0 : i64, tpu.core_type = #tpu.core_type<tc>, window_params = [{transform_indices = @transform_0, window_bounds = array<i64: 1, 8, 128>}, {transform_indices = @transform_1, window_bounds = array<i64: 8, 1>}, {transform_indices = @transform_2, window_bounds = array<i64: 8, 1>}, {transform_indices = @transform_3, window_bounds = array<i64: 1, 8, 128>}]} {
    %c0 = arith.constant 0 : index
    %c0_0 = arith.constant 0 : index
    %c0_1 = arith.constant 0 : index
    %0 = vector.load %arg3[%c0, %c0_0, %c0_1] : memref<1x8x128xf32, #tpu.memory_space<vmem>>, vector<1x8x128xf32>
    %1 = vector.shape_cast %0 : vector<1x8x128xf32> to vector<8x128xf32>
    %c0_2 = arith.constant 0 : index
    %c0_3 = arith.constant 0 : index
    %2 = vector.load %arg4[%c0_2, %c0_3] : memref<8x1xf32, #tpu.memory_space<vmem>>, vector<8x1xf32>
    %3 = vector.broadcast %2 : vector<8x1xf32> to vector<8x128xf32>
    %4 = arith.mulf %1, %3 : vector<8x128xf32>
    %c0_4 = arith.constant 0 : index
    %c0_5 = arith.constant 0 : index
    %5 = vector.load %arg5[%c0_4, %c0_5] : memref<8x1xf32, #tpu.memory_space<vmem>>, vector<8x1xf32>
    %6 = vector.broadcast %5 : vector<8x1xf32> to vector<8x128xf32>
    %7 = arith.addf %4, %6 : vector<8x128xf32>
    %c0_6 = arith.constant 0 : index
    %c0_7 = arith.constant 0 : index
    %c0_8 = arith.constant 0 : index
    %8 = vector.load %arg6[%c0_6, %c0_7, %c0_8] : memref<1x8x128xf32, #tpu.memory_space<vmem>>, vector<1x8x128xf32>
    %9 = vector.shape_cast %8 : vector<1x8x128xf32> to vector<8x128xf32>
    %10 = vector.shape_cast %7 : vector<8x128xf32> to vector<1x8x128xf32>
    tpu.vector_store %arg6[%c0_6, %c0_7, %c0_8], %10 {strides = array<i32>} : memref<1x8x128xf32, #tpu.memory_space<vmem>>, vector<1x8x128xf32>,
    return
  }
  func.func @transform_0(%arg0: i32, %arg1: i32, %arg2: i32) -> (i32, i32, i32) {
    %c0_i32 = arith.constant 0 : i32
    return %arg2, %arg0, %arg1 : i32, i32, i32
  }
  func.func @transform_1(%arg0: i32, %arg1: i32, %arg2: i32) -> (i32, i32) {
    %c0_i32 = arith.constant 0 : i32
    %c0_i32_0 = arith.constant 0 : i32
    return %arg0, %c0_i32 : i32, i32
  }
  func.func @transform_2(%arg0: i32, %arg1: i32, %arg2: i32) -> (i32, i32) {
    %c0_i32 = arith.constant 0 : i32
    %c0_i32_0 = arith.constant 0 : i32
    return %arg0, %c0_i32 : i32, i32
  }
  func.func @transform_3(%arg0: i32, %arg1: i32, %arg2: i32) -> (i32, i32, i32) {
    %c0_i32 = arith.constant 0 : i32
    return %arg2, %arg0, %arg1 : i32, i32, i32
  }
}

</mosaic_0001>

<bundles_post_ra>
// kernel: tpu_custom_call.1
= control target key start
LH: loop header
LB: loop body
LE: loop exit
PB: predicated region body
PF: predicated region fallthrough
CT: control target
= control target key end

     0   :  { %8 = vsyncpa [#allocation3], 0  ;;  %s675_s0 = inlined_call_operand.vmem [shape: f32[2,8,128], index: 0, kind: input, shape index: {}]   ;;  %s676_s1 = inlined_call_operand.vmem [shape: f32[8,1], index: 1, kind: input, shape index: {}]   ;;  %s677_s2 = inlined_call_operand.vmem [shape: f32[8,1], index: 2, kind: input, shape index: {}]   ;;  %s678_s3 = inlined_call_operand.hbm [shape: f32[2,8,128], index: 3, kind: output, shape index: {}]  }
   0x1   :  { %10 = vsyncpa [#allocation3 + $0x1], 0  ;;  %s557_s12 = smov 0   ;;  %s559_s13 = smov 0  }
   0x2   :  { %s561_s14 = smov 0   ;;  %s563_s15 = smov 0  }
   0x3   :  { %s565_s16 = smov 0   ;;  %s567_s17 = smov 0  }
   0x4 LB: > { %s385_s18 = sadd.s32 4294967295, %s533_s17   ;;  %s386_s19 = sadd.s32 4294967294, %s533_s17   ;;  %s533_s17 = sphi %s567_s17, %s16_s17   ;;  %s529_s16 = sphi %s565_s16, %s685_s16   ;;  %s525_s15 = sphi %s563_s15, %s684_s15   ;;  %s521_s14 = sphi %s561_s14, %s683_s14   ;;  %s517_s13 = sphi %s559_s13, %s682_s13   ;;  %s513_s12 = sphi %s557_s12, %s681_s12  }
   0x5   : > { %s28_s20 = sadd.s32 1, %s529_s16  ;;  %s128_s21 = sadd.s32 1, %s521_s14 }
   0x6   : > { %p29_p0 = scmp.ge.s32.totalorder %s28_s20, 2  ;;  %p138_p1 = scmp.ne.s32.totalorder %s521_s14, %s517_s13 }
   0x7   : > { %p139_p2 = scmp.eq.s32.totalorder %s385_s18, 1  ;;  %p144_p3 = scmp.ne.s32.totalorder %s517_s13, %s513_s12 }
   0x8   : > { %s687_s20 = smov (%p29_p0, %s28_s20), 0  ;;  %p145_p5 = scmp.eq.s32.totalorder %s386_s19, 1 }
   0x9   : > { %p597_p4 = por %p139_p2, %p138_p1  ;;  %s121_s23 = ssub.s32 %s529_s16, %s687_s20 }
   0xa   : > { %p391_p6 = scmp.ge.s32.totalorder %s533_s17, 1  ;;  %p126_p7 = scmp.eq.s32.totalorder %s121_s23, 0 }
   0xb   : > { %p604_p8 = por %p145_p5, %p144_p3  ;;  %p190_p9 = scmp.lt.s32.totalorder %s533_s17, 3 }
   0xc   : > { %s610_s25 = scalar_select %p126_p7, %s521_s14, %s128_s21  }
   0xd   : > { %p191_p10 = pnand %p391_p6, %p190_p9 }
   0xe   : > { %v246_v0 = vld [vmem:[%s676_s1] sm:$0xff] (!%p191_p10)  ;;  %v535_v1 = vmov (!%p191_p10), 0   ;;  %p227_p11 = scmp.lt.s32.totalorder (!%p191_p10), %s525_s15, 1  ;;  %s224_s4 = sand.u32 (!%p191_p10), 1, %s517_s13  }
   0xf   : > { %194 = sbr.rel (%p191_p10) target bundleno = 164 (0xa4), region = 32  ;;  %454 = vset.pattern.permute.xlu0 (!%p191_p10), %v535_v1  ;;  %v253_v2 = vld [vmem:[%s677_s2] sm:$0xff] (!%p191_p10)  ;;  %s392_s6 = sshll.u32 (!%p191_p10), %s224_s4, 3 }
  0x10   : > { %249 = vperm.xlu0 (!%p191_p10), %454, %v246_v0   ;;  %s395_s10 = sshll.u32 (!%p191_p10), %s525_s15, 7  ;;  %s226_s11 = scalar_lea.vmem (!%p191_p10), [#allocation2], %s392_s6 }
  0x11   : > { %s277_s18 = sshll.u32 (!%p191_p10), %s226_s11, 4  ;;  %s628_s23 = scalar_lea.hbm (!%p191_p10), %s678_s3, %s395_s10  ;;  %s630_s18 = int_to_ptr.vmem [resolvable:$true] %s277_s18 }
  0x12   : > { %s262_s26 = scalar_lea.sflag (!%p191_p10), [#allocation3], %s224_s4  ;;  %s455_s27 = scalar_lea.vmem (!%p191_p10), %s630_s18, 128 }
  0x13   : > { %p456_p12 = scmp.ne.s32.totalorder (!%p191_p10), %s630_s18, %s455_s27 }
  0x14   : > { %256 = vperm.xlu0 (!%p191_p10), %454, %v253_v2  }
  0x15   : > { %p457_p13 = pnand (!%p191_p10), %p456_p12, %p597_p4 }
  0x16   : > { %s228_s30 = scalar_select %p227_p11, %s525_s15, 1 }
  0x17   : > { %p458_p0 = pneg %p457_p13  ;;  %s536_s15 = smov [#allocation2]  }
  0x18   : > { %s393_s5 = sshll.u32 %s228_s30, 3  ;;  %s459_s28 = sshll.u32 %s536_s15, 4  ;;  %s460_s28 = int_to_ptr.vmem [resolvable:$false] %s459_s28 }
  0x19   : > { %s236_s9 = scalar_lea.vmem %s675_s0, %s393_s5  ;;  %s461_s29 = scalar_lea.vmem %s460_s28, 256 }
  0x1a   : > { %v245_v4 = vld [vmem:[%s236_s9] sm:$0xff]  ;;  %p462_p1 = scmp.lt.s32.totalorder %s630_s18, %s460_s28  ;;  %p463_p2 = scmp.lt.s32.totalorder %s461_s29, %s455_s27 }
  0x1c   : > { %p464_p3 = por %p463_p2, %p462_p1 }
  0x1e   : > { %p465_p5 = pnand %p464_p3, %p458_p0 }
  0x8f   : > { %v250_v3 = vpop.permute.xlu0 %249 }
  0x90   : > { %v252_v5 = vmul.f32 %v250_v3, %v245_v4 }
  0x93   : > { %v257_v6 = vpop.permute.xlu0 %256 }
  0x94   : > { %v259_v7 = vadd.f32 %v257_v6, %v252_v5 }
  0x96   : > { %260 = vst [vmem:[%s226_s11] sm:$0xff] %v259_v7 }
  0x97   : > { %468 = shalt.err (!%p465_p5)
}
  0x98   : > { %s469_s30 = scalar_lea.hbm %s628_s23, 128  ;;  %s473_s6 = scalar_lea.hbm %s678_s3, 256 }
  0x99   : > { %p470_p6 = scmp.ne.s32.totalorder %s628_s23, %s469_s30  ;;  %p474_p10 = scmp.lt.u32.totalorder %s628_s23, %s678_s3 }
  0x9a   : > { %p475_p11 = scmp.lt.u32.totalorder %s473_s6, %s469_s30  ;;  %p477_p13 = scmp.lt.u32.totalorder %s469_s30, %s628_s23 }
  0x9b   : > { %p471_p7 = pnand %p470_p6, %p597_p4 }
  0x9c   : > { %p476_p12 = por %p475_p11, %p474_p10 }
  0x9d   : > { %p472_p9 = pneg %p471_p7 }
  0x9e   : > { %p478_p0 = por %p477_p13, %p476_p12 }
  0xa0   : > { %p479_p1 = pnand %p478_p0, %p472_p9 }
  0xa2   : > { %482 = shalt.err (!%p479_p1)
}
  0xa3   : > { %398 = dma.vmem_to_hbm [thread:$0]  (%p597_p4), %s630_s18, 128, %s628_s23, %s262_s26  }
  0xa4 PF: > { %p404_p2 = scmp.ge.s32.totalorder %s533_s17, 2  ;;  %s289_s9 = sand.u32 1, %s513_s12  }
  0xa5   : > { %s290_s10 = scalar_lea.sflag [#allocation3], %s289_s9 }
  0xa6   : > { %p401_p3 = pnand %p404_p2, %p604_p8 }
  0xa8   : > { %508 = dma.done.wait (!%p401_p3), %s290_s10, 128  }
  0xa9   : > { %510 = vsyncadd (!%p401_p3), %s290_s10, 4294967168  ;;  %s16_s17 = sadd.s32 1, %s533_s17   ;;  %s681_s12 = smov %s517_s13 }
  0xaa   : > { %p13_p5 = scmp.ge.s32.totalorder %s16_s17, 4   ;;  %s682_s13 = smov %s521_s14 }
  0xab   : > { %s683_s14 = smov %s610_s25  ;;  %s684_s15 = smov %s529_s16 }
  0xac   : > { %s685_s16 = smov %s687_s20  ;;  %15 = sbr.rel (!%p13_p5) target bundleno = 4 (0x4), region = 73 }
  0xb3   :  { %295 = vsyncpa [#allocation3], 1 }
  0xb4   :  { %297 = vsyncpa [#allocation3 + $0x1], 1 }

</bundles_post_ra>
